<compile_context>
chip_gen: v7x
topology: tpu7x:2x2x1
jax: 0.10.0
libtpu: 0.0.40
codegen_flags: <defaults>
</compile_context>

<pallas_src>
import functools
import math

import jax
import jax.numpy as jnp
import numpy as np
from jax import lax
from jax.experimental import pallas as pl
from jax.experimental.pallas import tpu as pltpu


# ---------------------------------------------------------------------------
# Kernel
# ---------------------------------------------------------------------------

def _chunks(block_rows, valid_rows):
    """Static (row0, chunk_rows, chunk_valid) triples covering one block.

    Chunks fully past `valid_rows` (tail garbage of a partial last block) are
    skipped at compile time; the single boundary chunk carries a static row
    mask.  Everything here is Python-static, so interior blocks get zero
    masking work.
    """
    if block_rows % 8 != 0 or block_rows <= 128:
        return [(0, block_rows, valid_rows)]
    ch = 8
    for cand in (128, 64, 32, 16, 8):
        if block_rows % cand == 0:
            ch = cand
            break
    out = []
    for r0 in range(0, block_rows, ch):
        if r0 >= valid_rows:
            break
        out.append((r0, ch, min(ch, valid_rows - r0)))
    return out


def _rd_kernel(*refs, rows, block_rows, num_blocks, num_pairs, grid_t,
               num_pixels, xhat_numel):
    n_in = 5 + 2 * num_pairs
    in_refs = refs[:n_in]
    out_ref = refs[n_in]
    acc_y, acc_z, acc_s, acc_p, acc_m = refs[n_in + 1:]

    i = pl.program_id(0)

    @pl.when(i == 0)
    def _init():
        for acc in (acc_y, acc_z, acc_s, acc_p, acc_m):
            acc[...] = jnp.zeros_like(acc)

    def _load(ref, r0, nr):
        # Load a static row-chunk of the current block; cast to f32 in-kernel
        # (inputs stream through HBM at their native width).
        x = ref[pl.ds(r0, nr), :]
        if x.dtype != jnp.float32:
            x = x.astype(jnp.float32)
        return x

    def _row_mask(nr, valid):
        r = lax.broadcasted_iota(jnp.int32, (nr, 128), 0)
        return r < valid

    def _fold_add(acc_ref, v):
        # Fold (nr, 128) -> (8, 128) with plain vreg adds; the full cross-lane
        # reduce happens only once, in the epilogue.
        nr = v.shape[0]
        if nr % 8 == 0:
            acc_ref[...] += v.reshape(nr // 8, 8, 128).sum(axis=0)
        else:  # small resident stream whose row count is not a multiple of 8
            acc_ref[0:1, :] += jnp.sum(v, axis=0, keepdims=True)

    def _proc_chunk(kind, refs_, acc_ref, r0, ch, cvalid):
        if kind == 'log':
            x = _load(refs_[0], r0, ch)
            if cvalid < ch:                       # static: boundary chunk only
                x = jnp.where(_row_mask(ch, cvalid), x, 1.0)   # log(1) == 0
            v = jnp.log(x)
        else:
            d = _load(refs_[0], r0, ch) - _load(refs_[1], r0, ch)
            if cvalid < ch:
                d = jnp.where(_row_mask(ch, cvalid), d, 0.0)
            v = d * d if kind == 'sq' else jnp.abs(d)
        _fold_add(acc_ref, v)

    def _do_block(kind, refs_, acc_ref, br, valid):
        for (r0, ch, cv) in _chunks(br, valid):
            _proc_chunk(kind, refs_, acc_ref, r0, ch, cv)

    def _stream(kind, refs_, acc_ref, idx):
        r = rows[idx]
        br = block_rows[idx]
        nb = num_blocks[idx]
        tail_valid = r - (nb - 1) * br           # static rows valid in last blk
        if nb == grid_t and tail_valid == br:
            # Full-length stream, no tail: every grid step is a clean block.
            _do_block(kind, refs_, acc_ref, br, br)
        elif nb > 1:
            @pl.when(i < nb - 1)
            def _interior():
                _do_block(kind, refs_, acc_ref, br, br)

            @pl.when(i == nb - 1)
            def _tail():
                _do_block(kind, refs_, acc_ref, br, tail_valid)
        else:
            # Short resident stream (block == whole slab, clamped index map):
            # compute only on step 0, skip entirely afterwards.
            @pl.when(i == 0)
            def _once():
                _do_block(kind, refs_, acc_ref, br, tail_valid)

    # ---- bpp terms: sum(log(likelihoods)) ----
    _stream('log', (in_refs[0],), acc_y, 0)
    _stream('log', (in_refs[1],), acc_z, 1)
    _stream('log', (in_refs[2],), acc_s, 2)
    # ---- mse term: sum((x_hat - target)^2) ----
    _stream('sq', (in_refs[3], in_refs[4]), acc_m, 3)
    # ---- pred term: sum_i |y_i - pred_i| ----
    for j in range(num_pairs):
        _stream('abs', (in_refs[5 + 2 * j], in_refs[6 + 2 * j]), acc_p, 5 + 2 * j)

    # ---- epilogue: one cross-lane reduce + scaling per output ----
    @pl.when(i == grid_t - 1)
    def _finalize():
        neg_inv = jnp.float32(-1.0 / (math.log(2.0) * num_pixels))
        zero = jnp.float32(0.0)
        out_ref[0] = jnp.sum(acc_y[...]) * neg_inv
        out_ref[1] = jnp.sum(acc_z[...]) * neg_inv
        out_ref[2] = jnp.sum(acc_s[...]) * neg_inv
        out_ref[3] = jnp.sum(acc_p[...]) * jnp.float32(1.0 / num_pixels)
        out_ref[4] = jnp.sum(acc_m[...]) * jnp.float32(255.0 ** 2 / xhat_numel)
        out_ref[5] = zero
        out_ref[6] = zero
        out_ref[7] = zero


# ---------------------------------------------------------------------------
# Wrapper
# ---------------------------------------------------------------------------

def _flatten_rows(x, neutral):
    """Flatten to a lane-dense (rows, 128) slab in the input's NATIVE dtype.

    Pure reshape (free bitcast) unless numel % 128 != 0, in which case a small
    reduction-neutral pad copy is made (rare for NCHW image / latent shapes).
    """
    x = jnp.asarray(x)
    flat = x.reshape(-1)
    n = int(flat.shape[0])
    pad = (-n) % 128
    if pad:
        # TODO(synk): rare path; a tail-in-wrapper scheme could avoid this copy.
        flat = jnp.concatenate([flat, jnp.full((pad,), neutral, flat.dtype)])
    return flat.reshape(-1, 128)


def _row_granule(dtype):
    # Sublane granule of the packed dtype: 8 for 4-byte, 16 for bf16, 32 for i8.
    return max(8, 32 // jnp.dtype(dtype).itemsize)


def _make_index_map(nb, grid_t):
    if nb >= grid_t:
        return lambda i: (i, 0)
    last = nb - 1
    # Short stream: clamp -> block index stops changing -> block stays resident
    # in VMEM (no re-DMA); its compute is skipped in-kernel via pl.when.
    return lambda i: (jnp.minimum(i, last), 0)


def rate_distortion_loss2(output, target, lmbda=0.01, alpha=1.0,
                          tile_rows=1024, long_stream_buffers=2):
    target = jnp.asarray(target)
    N, _, H, W = target.shape
    num_pixels = N * H * W
    xhat_numel = int(np.prod(target.shape))

    # Streams: [lk_y, lk_z, lk_slice, x_hat, target, y_0, pred_0, y_1, pred_1, ...]
    slabs = [
        _flatten_rows(output['likelihoods']['y'], 1.0),
        _flatten_rows(output['likelihoods']['z'], 1.0),
        _flatten_rows(output['likelihoods']['slice'], 1.0),
        _flatten_rows(output['x_hat'], 0.0),
        _flatten_rows(target, 0.0),
    ]
    y_list = list(output['y'])
    pred_list = list(output['preds'])
    assert len(y_list) == len(pred_list)
    num_pairs = len(pred_list)
    for yi, pi in zip(y_list, pred_list):
        slabs.append(_flatten_rows(yi, 0.0))
        slabs.append(_flatten_rows(pi, 0.0))

    # Per-stream dtype granules; paired streams must share a block shape.
    granules = [_row_granule(s.dtype) for s in slabs]
    pairs = [(3, 4)] + [(5 + 2 * j, 6 + 2 * j) for j in range(num_pairs)]
    for a, b in pairs:
        g = max(granules[a], granules[b])
        granules[a] = granules[b] = g

    rows, block_rows, num_blocks = [], [], []
    for s, g in zip(slabs, granules):
        r = int(s.shape[0])
        br = max(g, (tile_rows // g) * g)
        if r <= br:
            br, nb = r, 1            # whole short slab stays resident in VMEM
        else:
            nb = int(pl.cdiv(r, br))
        rows.append(r)
        block_rows.append(br)
        num_blocks.append(nb)
    grid_t = int(max(num_blocks))

    in_specs = []
    for br, nb in zip(block_rows, num_blocks):
        idx_map = _make_index_map(nb, grid_t)
        if long_stream_buffers > 2 and nb >= 3:
            spec = pl.BlockSpec((br, 128), idx_map,
                                pipeline_mode=pl.Buffered(long_stream_buffers))
        else:
            spec = pl.BlockSpec((br, 128), idx_map)
        in_specs.append(spec)

    kernel = functools.partial(
        _rd_kernel,
        rows=tuple(rows),
        block_rows=tuple(block_rows),
        num_blocks=tuple(num_blocks),
        num_pairs=num_pairs,
        grid_t=grid_t,
        num_pixels=float(num_pixels),
        xhat_numel=float(xhat_numel),
    )

    total_elems = sum(int(np.prod(s.shape)) for s in slabs)
    total_bytes = sum(int(np.prod(s.shape)) * s.dtype.itemsize for s in slabs)
    log_elems = sum(int(np.prod(s.shape)) for s in slabs[:3])
    cost = pl.CostEstimate(
        flops=3 * total_elems,
        transcendentals=log_elems,
        bytes_accessed=total_bytes + 32,
    )

    # Double-buffered input working set + accumulators + headroom; lift v5e's
    # 16 MiB default scoped VMEM when needed while staying well under v7x's
    # 64 MiB physical VMEM.
    block_bytes = sum(br * 128 * s.dtype.itemsize
                      for br, s in zip(block_rows, slabs))
    vmem_limit = int(min(48 * 1024 * 1024,
                         max(24 * 1024 * 1024, 2 * block_bytes + (4 << 20))))

    res = pl.pallas_call(
        kernel,
        out_shape=jax.ShapeDtypeStruct((8,), jnp.float32),
        grid=(grid_t,),
        in_specs=in_specs,
        out_specs=pl.BlockSpec(memory_space=pltpu.MemorySpace.SMEM),
        scratch_shapes=[pltpu.VMEM((8, 128), jnp.float32) for _ in range(5)],
        compiler_params=pltpu.CompilerParams(
            dimension_semantics=("arbitrary",),
            vmem_limit_bytes=vmem_limit),
        cost_estimate=cost,
    )(*slabs)

    out = {
        'y_bpp_loss': res[0],
        'z_bpp_loss': res[1],
        'slice_bpp_loss': res[2],
        'bpp_loss': res[0] + res[1] + res[2],
        'pred_loss': res[3],
        'mse_loss': res[4],
    }
    out['loss'] = lmbda * out['mse_loss'] + out['bpp_loss'] + alpha * out['pred_loss']
    return out


# ---------------------------------------------------------------------------
# Pure-JAX reference mirroring the PyTorch forward exactly
# ---------------------------------------------------------------------------

def _reference(output, target, lmbda=0.01, alpha=1.0):
    N, _, H, W = target.shape
    num_pixels = N * H * W
    ln2 = math.log(2.0)

    def bpp(x):
        return jnp.sum(jnp.log(x)) / (-ln2 * num_pixels)

    out = {}
    out['y_bpp_loss'] = bpp(output['likelihoods']['y'])
    out['z_bpp_loss'] = bpp(output['likelihoods']['z'])
    out['slice_bpp_loss'] = bpp(output['likelihoods']['slice'])
    out['bpp_loss'] = out['y_bpp_loss'] + out['z_bpp_loss'] + out['slice_bpp_loss']
    pred_loss = 0.0
    for i in range(len(output['preds'])):
        pred_loss = pred_loss + jnp.sum(
            jnp.abs(output['y'][i] - output['preds'][i])) / num_pixels
    out['pred_loss'] = pred_loss
    out['mse_loss'] = jnp.mean((output['x_hat'] - target) ** 2) * 255.0 ** 2
    out['loss'] = lmbda * out['mse_loss'] + out['bpp_loss'] + alpha * out['pred_loss']
    return out


if __name__ == "__main__":
    key = jax.random.PRNGKey(0)
    keys = jax.random.split(key, 10)

    # Small shapes consistent with the forward pass (NCHW images; latent tensors).
    N, C, H, W = 2, 3, 16, 16
    Cy, Hy, Wy = 8, 8, 8  # latent resolution

    target = jax.random.uniform(keys[0], (N, C, H, W), jnp.float32)
    x_hat = jnp.clip(target + 0.05 * jax.random.normal(keys[1], (N, C, H, W), jnp.float32), 0.0, 1.0)

    lk_y = jax.random.uniform(keys[2], (N, Cy, Hy, Wy), jnp.float32, minval=1e-3, maxval=1.0)
    # lk_z numel (96) is deliberately NOT a multiple of 128 to exercise the pad path.
    lk_z = jax.random.uniform(keys[3], (N, 4, 4, 3), jnp.float32, minval=1e-3, maxval=1.0)
    lk_s = jax.random.uniform(keys[4], (N, Cy, Hy, Wy), jnp.float32, minval=1e-3, maxval=1.0)

    y_list = [jax.random.normal(keys[5], (N, Cy, Hy, Wy), jnp.float32),
              jax.random.normal(keys[6], (N, Cy, Hy, Wy), jnp.float32)]
    preds = [y_list[0] + 0.1 * jax.random.normal(keys[7], (N, Cy, Hy, Wy), jnp.float32),
             y_list[1] + 0.1 * jax.random.normal(keys[8], (N, Cy, Hy, Wy), jnp.float32)]

    output = {
        'likelihoods': {'y': lk_y, 'z': lk_z, 'slice': lk_s},
        'y': y_list,
        'preds': preds,
        'x_hat': x_hat,
    }

    names = ['y_bpp_loss', 'z_bpp_loss', 'slice_bpp_loss', 'bpp_loss',
             'pred_loss', 'mse_loss', 'loss']

    # 1) f32 inputs: default (production) tiling plus a tiny tiling that forces
    #    a multi-step grid (pipelined DMAs, clamped resident short streams,
    #    statically-masked partial tail blocks).
    ref = _reference(output, target, lmbda=0.01, alpha=1.0)
    for tr in (1024, 8):
        got = rate_distortion_loss2(output, target, lmbda=0.01, alpha=1.0, tile_rows=tr)
        jax.block_until_ready(got['loss'])
        for name in names:
            np.testing.assert_allclose(np.asarray(got[name]), np.asarray(ref[name]),
                                       rtol=1e-4, atol=1e-4)

    # 2) bf16 inputs (native-dtype streaming; target kept f32 to exercise a
    #    mixed-dtype x_hat/target pair).  Reference uses the same bf16 values
    #    upcast to f32, matching the kernel's in-kernel cast.
    to_bf16 = lambda a: a.astype(jnp.bfloat16)
    output_bf16 = {
        'likelihoods': {k: to_bf16(v) for k, v in output['likelihoods'].items()},
        'y': [to_bf16(v) for v in y_list],
        'preds': [to_bf16(v) for v in preds],
        'x_hat': to_bf16(x_hat),
    }
    output_bf16_as_f32 = jax.tree_util.tree_map(lambda a: a.astype(jnp.float32), output_bf16)
    ref_bf = _reference(output_bf16_as_f32, target, lmbda=0.01, alpha=1.0)
    for tr in (1024, 8):
        got_bf = rate_distortion_loss2(output_bf16, target, lmbda=0.01, alpha=1.0, tile_rows=tr)
        jax.block_until_ready(got_bf['loss'])
        for name in names:
            np.testing.assert_allclose(np.asarray(got_bf[name]), np.asarray(ref_bf[name]),
                                       rtol=2e-4, atol=2e-4)

    print("KERNEL_OK")
</pallas_src>

<mosaic_0001>
module attributes {stable_mosaic.version = 11 : i64} {
  func.func @_rd_kernel(%arg0: i32, %arg1: memref<8x128xf32, #tpu.memory_space<vmem>>, %arg2: memref<1x128xf32, #tpu.memory_space<vmem>>, %arg3: memref<8x128xf32, #tpu.memory_space<vmem>>, %arg4: memref<12x128xf32, #tpu.memory_space<vmem>>, %arg5: memref<12x128xf32, #tpu.memory_space<vmem>>, %arg6: memref<8x128xf32, #tpu.memory_space<vmem>>, %arg7: memref<8x128xf32, #tpu.memory_space<vmem>>, %arg8: memref<8x128xf32, #tpu.memory_space<vmem>>, %arg9: memref<8x128xf32, #tpu.memory_space<vmem>>, %arg10: memref<8xf32, #tpu.memory_space<smem>>, %arg11: memref<8x128xf32, #tpu.memory_space<vmem>>, %arg12: memref<8x128xf32, #tpu.memory_space<vmem>>, %arg13: memref<8x128xf32, #tpu.memory_space<vmem>>, %arg14: memref<8x128xf32, #tpu.memory_space<vmem>>, %arg15: memref<8x128xf32, #tpu.memory_space<vmem>>) attributes {dimension_semantics = [#tpu.dimension_semantics<arbitrary>], iteration_bounds = array<i64: 1>, scalar_prefetch = 0 : i64, scratch_operands = 5 : i64, tpu.core_type = #tpu.core_type<tc>, window_params = [{transform_indices = @transform_0, window_bounds = array<i64: 8, 128>}, {transform_indices = @transform_1, window_bounds = array<i64: 1, 128>}, {transform_indices = @transform_2, window_bounds = array<i64: 8, 128>}, {transform_indices = @transform_3, window_bounds = array<i64: 12, 128>}, {transform_indices = @transform_4, window_bounds = array<i64: 12, 128>}, {transform_indices = @transform_5, window_bounds = array<i64: 8, 128>}, {transform_indices = @transform_6, window_bounds = array<i64: 8, 128>}, {transform_indices = @transform_7, window_bounds = array<i64: 8, 128>}, {transform_indices = @transform_8, window_bounds = array<i64: 8, 128>}, {transform_indices = @transform_9, window_bounds = array<i64: 8>}]} {
    %c0_i32 = arith.constant 0 : i32
    %0 = arith.cmpi eq, %arg0, %c0_i32 : i32
    %1 = arith.extui %0 : i1 to i32
    %c0_i32_0 = arith.constant 0 : i32
    %2 = arith.cmpi ne, %1, %c0_i32_0 : i32
    scf.if %2 {
      %cst_49 = arith.constant 0.000000e+00 : f32
      %54 = vector.broadcast %cst_49 : f32 to vector<8x128xf32>
      %c0_50 = arith.constant 0 : index
      %c0_51 = arith.constant 0 : index
      %55 = vector.load %arg11[%c0_50, %c0_51] : memref<8x128xf32, #tpu.memory_space<vmem>>, vector<8x128xf32>
      tpu.vector_store %arg11[%c0_50, %c0_51], %54 {strides = array<i32>} : memref<8x128xf32, #tpu.memory_space<vmem>>, vector<8x128xf32>,
      %cst_52 = arith.constant 0.000000e+00 : f32
      %56 = vector.broadcast %cst_52 : f32 to vector<8x128xf32>
      %c0_53 = arith.constant 0 : index
      %c0_54 = arith.constant 0 : index
      %57 = vector.load %arg12[%c0_53, %c0_54] : memref<8x128xf32, #tpu.memory_space<vmem>>, vector<8x128xf32>
      tpu.vector_store %arg12[%c0_53, %c0_54], %56 {strides = array<i32>} : memref<8x128xf32, #tpu.memory_space<vmem>>, vector<8x128xf32>,
      %cst_55 = arith.constant 0.000000e+00 : f32
      %58 = vector.broadcast %cst_55 : f32 to vector<8x128xf32>
      %c0_56 = arith.constant 0 : index
      %c0_57 = arith.constant 0 : index
      %59 = vector.load %arg13[%c0_56, %c0_57] : memref<8x128xf32, #tpu.memory_space<vmem>>, vector<8x128xf32>
      tpu.vector_store %arg13[%c0_56, %c0_57], %58 {strides = array<i32>} : memref<8x128xf32, #tpu.memory_space<vmem>>, vector<8x128xf32>,
      %cst_58 = arith.constant 0.000000e+00 : f32
      %60 = vector.broadcast %cst_58 : f32 to vector<8x128xf32>
      %c0_59 = arith.constant 0 : index
      %c0_60 = arith.constant 0 : index
      %61 = vector.load %arg14[%c0_59, %c0_60] : memref<8x128xf32, #tpu.memory_space<vmem>>, vector<8x128xf32>
      tpu.vector_store %arg14[%c0_59, %c0_60], %60 {strides = array<i32>} : memref<8x128xf32, #tpu.memory_space<vmem>>, vector<8x128xf32>,
      %cst_61 = arith.constant 0.000000e+00 : f32
      %62 = vector.broadcast %cst_61 : f32 to vector<8x128xf32>
      %c0_62 = arith.constant 0 : index
      %c0_63 = arith.constant 0 : index
      %63 = vector.load %arg15[%c0_62, %c0_63] : memref<8x128xf32, #tpu.memory_space<vmem>>, vector<8x128xf32>
      tpu.vector_store %arg15[%c0_62, %c0_63], %62 {strides = array<i32>} : memref<8x128xf32, #tpu.memory_space<vmem>>, vector<8x128xf32>,
    } else {
    }
    %c0 = arith.constant 0 : index
    %c0_1 = arith.constant 0 : index
    %3 = vector.load %arg1[%c0, %c0_1] : memref<8x128xf32, #tpu.memory_space<vmem>>, vector<8x128xf32>
    %4 = math.log %3 : vector<8x128xf32>
    %c0_2 = arith.constant 0 : index
    %c0_3 = arith.constant 0 : index
    %5 = vector.load %arg11[%c0_2, %c0_3] : memref<8x128xf32, #tpu.memory_space<vmem>>, vector<8x128xf32>
    %6 = vector.shape_cast %4 : vector<8x128xf32> to vector<1x8x128xf32>
    %cst = arith.constant dense<0.000000e+00> : vector<8x128xf32>
    %7 = vector.multi_reduction <add>, %6, %cst [0] : vector<1x8x128xf32> to vector<8x128xf32>
    %8 = arith.addf %5, %7 : vector<8x128xf32>
    %c0_4 = arith.constant 0 : index
    %c0_5 = arith.constant 0 : index
    %9 = vector.load %arg11[%c0_4, %c0_5] : memref<8x128xf32, #tpu.memory_space<vmem>>, vector<8x128xf32>
    tpu.vector_store %arg11[%c0_4, %c0_5], %8 {strides = array<i32>} : memref<8x128xf32, #tpu.memory_space<vmem>>, vector<8x128xf32>,
    %c0_6 = arith.constant 0 : index
    %c0_7 = arith.constant 0 : index
    %10 = vector.load %arg2[%c0_6, %c0_7] : memref<1x128xf32, #tpu.memory_space<vmem>>, vector<1x128xf32>
    %11 = math.log %10 : vector<1x128xf32>
    %c0_8 = arith.constant 0 : index
    %c0_9 = arith.constant 0 : index
    %12 = vector.load %arg12[%c0_8, %c0_9] : memref<8x128xf32, #tpu.memory_space<vmem>>, vector<1x128xf32>
    %cst_10 = arith.constant dense<0.000000e+00> : vector<128xf32>
    %13 = vector.multi_reduction <add>, %11, %cst_10 [0] : vector<1x128xf32> to vector<128xf32>
    %14 = vector.shape_cast %13 : vector<128xf32> to vector<1x128xf32>
    %15 = arith.addf %12, %14 : vector<1x128xf32>
    %c0_11 = arith.constant 0 : index
    %c0_12 = arith.constant 0 : index
    %16 = vector.load %arg12[%c0_11, %c0_12] : memref<8x128xf32, #tpu.memory_space<vmem>>, vector<1x128xf32>
    tpu.vector_store %arg12[%c0_11, %c0_12], %15 {strides = array<i32>} : memref<8x128xf32, #tpu.memory_space<vmem>>, vector<1x128xf32>,
    %c0_13 = arith.constant 0 : index
    %c0_14 = arith.constant 0 : index
    %17 = vector.load %arg3[%c0_13, %c0_14] : memref<8x128xf32, #tpu.memory_space<vmem>>, vector<8x128xf32>
    %18 = math.log %17 : vector<8x128xf32>
    %c0_15 = arith.constant 0 : index
    %c0_16 = arith.constant 0 : index
    %19 = vector.load %arg13[%c0_15, %c0_16] : memref<8x128xf32, #tpu.memory_space<vmem>>, vector<8x128xf32>
    %20 = vector.shape_cast %18 : vector<8x128xf32> to vector<1x8x128xf32>
    %cst_17 = arith.constant dense<0.000000e+00> : vector<8x128xf32>
    %21 = vector.multi_reduction <add>, %20, %cst_17 [0] : vector<1x8x128xf32> to vector<8x128xf32>
    %22 = arith.addf %19, %21 : vector<8x128xf32>
    %c0_18 = arith.constant 0 : index
    %c0_19 = arith.constant 0 : index
    %23 = vector.load %arg13[%c0_18, %c0_19] : memref<8x128xf32, #tpu.memory_space<vmem>>, vector<8x128xf32>
    tpu.vector_store %arg13[%c0_18, %c0_19], %22 {strides = array<i32>} : memref<8x128xf32, #tpu.memory_space<vmem>>, vector<8x128xf32>,
    %c0_20 = arith.constant 0 : index
    %c0_21 = arith.constant 0 : index
    %24 = vector.load %arg4[%c0_20, %c0_21] : memref<12x128xf32, #tpu.memory_space<vmem>>, vector<12x128xf32>
    %c0_22 = arith.constant 0 : index
    %c0_23 = arith.constant 0 : index
    %25 = vector.load %arg5[%c0_22, %c0_23] : memref<12x128xf32, #tpu.memory_space<vmem>>, vector<12x128xf32>
    %26 = arith.subf %24, %25 : vector<12x128xf32>
    %27 = arith.mulf %26, %26 : vector<12x128xf32>
    %c0_24 = arith.constant 0 : index
    %c0_25 = arith.constant 0 : index
    %28 = vector.load %arg15[%c0_24, %c0_25] : memref<8x128xf32, #tpu.memory_space<vmem>>, vector<1x128xf32>
    %cst_26 = arith.constant dense<0.000000e+00> : vector<128xf32>
    %29 = vector.multi_reduction <add>, %27, %cst_26 [0] : vector<12x128xf32> to vector<128xf32>
    %30 = vector.shape_cast %29 : vector<128xf32> to vector<1x128xf32>
    %31 = arith.addf %28, %30 : vector<1x128xf32>
    %c0_27 = arith.constant 0 : index
    %c0_28 = arith.constant 0 : index
    %32 = vector.load %arg15[%c0_27, %c0_28] : memref<8x128xf32, #tpu.memory_space<vmem>>, vector<1x128xf32>
    tpu.vector_store %arg15[%c0_27, %c0_28], %31 {strides = array<i32>} : memref<8x128xf32, #tpu.memory_space<vmem>>, vector<1x128xf32>,
    %c0_29 = arith.constant 0 : index
    %c0_30 = arith.constant 0 : index
    %33 = vector.load %arg6[%c0_29, %c0_30] : memref<8x128xf32, #tpu.memory_space<vmem>>, vector<8x128xf32>
    %c0_31 = arith.constant 0 : index
    %c0_32 = arith.constant 0 : index
    %34 = vector.load %arg7[%c0_31, %c0_32] : memref<8x128xf32, #tpu.memory_space<vmem>>, vector<8x128xf32>
    %35 = arith.subf %33, %34 : vector<8x128xf32>
    %36 = math.absf %35 : vector<8x128xf32>
    %c0_33 = arith.constant 0 : index
    %c0_34 = arith.constant 0 : index
    %37 = vector.load %arg14[%c0_33, %c0_34] : memref<8x128xf32, #tpu.memory_space<vmem>>, vector<8x128xf32>
    %38 = vector.shape_cast %36 : vector<8x128xf32> to vector<1x8x128xf32>
    %cst_35 = arith.constant dense<0.000000e+00> : vector<8x128xf32>
    %39 = vector.multi_reduction <add>, %38, %cst_35 [0] : vector<1x8x128xf32> to vector<8x128xf32>
    %40 = arith.addf %37, %39 : vector<8x128xf32>
    %c0_36 = arith.constant 0 : index
    %c0_37 = arith.constant 0 : index
    %41 = vector.load %arg14[%c0_36, %c0_37] : memref<8x128xf32, #tpu.memory_space<vmem>>, vector<8x128xf32>
    tpu.vector_store %arg14[%c0_36, %c0_37], %40 {strides = array<i32>} : memref<8x128xf32, #tpu.memory_space<vmem>>, vector<8x128xf32>,
    %c0_38 = arith.constant 0 : index
    %c0_39 = arith.constant 0 : index
    %42 = vector.load %arg8[%c0_38, %c0_39] : memref<8x128xf32, #tpu.memory_space<vmem>>, vector<8x128xf32>
    %c0_40 = arith.constant 0 : index
    %c0_41 = arith.constant 0 : index
    %43 = vector.load %arg9[%c0_40, %c0_41] : memref<8x128xf32, #tpu.memory_space<vmem>>, vector<8x128xf32>
    %44 = arith.subf %42, %43 : vector<8x128xf32>
    %45 = math.absf %44 : vector<8x128xf32>
    %c0_42 = arith.constant 0 : index
    %c0_43 = arith.constant 0 : index
    %46 = vector.load %arg14[%c0_42, %c0_43] : memref<8x128xf32, #tpu.memory_space<vmem>>, vector<8x128xf32>
    %47 = vector.shape_cast %45 : vector<8x128xf32> to vector<1x8x128xf32>
    %cst_44 = arith.constant dense<0.000000e+00> : vector<8x128xf32>
    %48 = vector.multi_reduction <add>, %47, %cst_44 [0] : vector<1x8x128xf32> to vector<8x128xf32>
    %49 = arith.addf %46, %48 : vector<8x128xf32>
    %c0_45 = arith.constant 0 : index
    %c0_46 = arith.constant 0 : index
    %50 = vector.load %arg14[%c0_45, %c0_46] : memref<8x128xf32, #tpu.memory_space<vmem>>, vector<8x128xf32>
    tpu.vector_store %arg14[%c0_45, %c0_46], %49 {strides = array<i32>} : memref<8x128xf32, #tpu.memory_space<vmem>>, vector<8x128xf32>,
    %c0_i32_47 = arith.constant 0 : i32
    %51 = arith.cmpi eq, %arg0, %c0_i32_47 : i32
    %52 = arith.extui %51 : i1 to i32
    %c0_i32_48 = arith.constant 0 : i32
    %53 = arith.cmpi ne, %52, %c0_i32_48 : i32
    scf.if %53 {
      %c0_49 = arith.constant 0 : index
      %c0_50 = arith.constant 0 : index
      %54 = vector.load %arg11[%c0_49, %c0_50] : memref<8x128xf32, #tpu.memory_space<vmem>>, vector<8x128xf32>
      %55 = vector.shape_cast %54 : vector<8x128xf32> to vector<1x8x128xf32>
      %cst_51 = arith.constant dense<0.000000e+00> : vector<1xf32>
      %56 = vector.multi_reduction <add>, %55, %cst_51 [1, 2] : vector<1x8x128xf32> to vector<1xf32>
      %57 = vector.shape_cast %56 : vector<1xf32> to vector<1x1x1xf32>
      %58 = vector.extract %57[0, 0, 0] : f32 from vector<1x1x1xf32>
      %cst_52 = arith.constant -0.00281776371 : f32
      %59 = arith.mulf %58, %cst_52 : f32
      %c0_53 = arith.constant 0 : index
      %60 = memref.load %arg10[%c0_53] : memref<8xf32, #tpu.memory_space<smem>>
      memref.store %59, %arg10[%c0_53] : memref<8xf32, #tpu.memory_space<smem>>
      %c0_54 = arith.constant 0 : index
      %c0_55 = arith.constant 0 : index
      %61 = vector.load %arg12[%c0_54, %c0_55] : memref<8x128xf32, #tpu.memory_space<vmem>>, vector<8x128xf32>
      %62 = vector.shape_cast %61 : vector<8x128xf32> to vector<1x8x128xf32>
      %cst_56 = arith.constant dense<0.000000e+00> : vector<1xf32>
      %63 = vector.multi_reduction <add>, %62, %cst_56 [1, 2] : vector<1x8x128xf32> to vector<1xf32>
      %64 = vector.shape_cast %63 : vector<1xf32> to vector<1x1x1xf32>
      %65 = vector.extract %64[0, 0, 0] : f32 from vector<1x1x1xf32>
      %cst_57 = arith.constant -0.00281776371 : f32
      %66 = arith.mulf %65, %cst_57 : f32
      %c1 = arith.constant 1 : index
      %67 = memref.load %arg10[%c1] : memref<8xf32, #tpu.memory_space<smem>>
      memref.store %66, %arg10[%c1] : memref<8xf32, #tpu.memory_space<smem>>
      %c0_58 = arith.constant 0 : index
      %c0_59 = arith.constant 0 : index
      %68 = vector.load %arg13[%c0_58, %c0_59] : memref<8x128xf32, #tpu.memory_space<vmem>>, vector<8x128xf32>
      %69 = vector.shape_cast %68 : vector<8x128xf32> to vector<1x8x128xf32>
      %cst_60 = arith.constant dense<0.000000e+00> : vector<1xf32>
      %70 = vector.multi_reduction <add>, %69, %cst_60 [1, 2] : vector<1x8x128xf32> to vector<1xf32>
      %71 = vector.shape_cast %70 : vector<1xf32> to vector<1x1x1xf32>
      %72 = vector.extract %71[0, 0, 0] : f32 from vector<1x1x1xf32>
      %cst_61 = arith.constant -0.00281776371 : f32
      %73 = arith.mulf %72, %cst_61 : f32
      %c2 = arith.constant 2 : index
      %74 = memref.load %arg10[%c2] : memref<8xf32, #tpu.memory_space<smem>>
      memref.store %73, %arg10[%c2] : memref<8xf32, #tpu.memory_space<smem>>
      %c0_62 = arith.constant 0 : index
      %c0_63 = arith.constant 0 : index
      %75 = vector.load %arg14[%c0_62, %c0_63] : memref<8x128xf32, #tpu.memory_space<vmem>>, vector<8x128xf32>
      %76 = vector.shape_cast %75 : vector<8x128xf32> to vector<1x8x128xf32>
      %cst_64 = arith.constant dense<0.000000e+00> : vector<1xf32>
      %77 = vector.multi_reduction <add>, %76, %cst_64 [1, 2] : vector<1x8x128xf32> to vector<1xf32>
      %78 = vector.shape_cast %77 : vector<1xf32> to vector<1x1x1xf32>
      %79 = vector.extract %78[0, 0, 0] : f32 from vector<1x1x1xf32>
      %cst_65 = arith.constant 0.001953125 : f32
      %80 = arith.mulf %79, %cst_65 : f32
      %c3 = arith.constant 3 : index
      %81 = memref.load %arg10[%c3] : memref<8xf32, #tpu.memory_space<smem>>
      memref.store %80, %arg10[%c3] : memref<8xf32, #tpu.memory_space<smem>>
      %c0_66 = arith.constant 0 : index
      %c0_67 = arith.constant 0 : index
      %82 = vector.load %arg15[%c0_66, %c0_67] : memref<8x128xf32, #tpu.memory_space<vmem>>, vector<8x128xf32>
      %83 = vector.shape_cast %82 : vector<8x128xf32> to vector<1x8x128xf32>
      %cst_68 = arith.constant dense<0.000000e+00> : vector<1xf32>
      %84 = vector.multi_reduction <add>, %83, %cst_68 [1, 2] : vector<1x8x128xf32> to vector<1xf32>
      %85 = vector.shape_cast %84 : vector<1xf32> to vector<1x1x1xf32>
      %86 = vector.extract %85[0, 0, 0] : f32 from vector<1x1x1xf32>
      %cst_69 = arith.constant 42.3339844 : f32
      %87 = arith.mulf %86, %cst_69 : f32
      %c4 = arith.constant 4 : index
      %88 = memref.load %arg10[%c4] : memref<8xf32, #tpu.memory_space<smem>>
      memref.store %87, %arg10[%c4] : memref<8xf32, #tpu.memory_space<smem>>
      %cst_70 = arith.constant 0.000000e+00 : f32
      %c5 = arith.constant 5 : index
      %89 = memref.load %arg10[%c5] : memref<8xf32, #tpu.memory_space<smem>>
      memref.store %cst_70, %arg10[%c5] : memref<8xf32, #tpu.memory_space<smem>>
      %cst_71 = arith.constant 0.000000e+00 : f32
      %c6 = arith.constant 6 : index
      %90 = memref.load %arg10[%c6] : memref<8xf32, #tpu.memory_space<smem>>
      memref.store %cst_71, %arg10[%c6] : memref<8xf32, #tpu.memory_space<smem>>
      %cst_72 = arith.constant 0.000000e+00 : f32
      %c7 = arith.constant 7 : index
      %91 = memref.load %arg10[%c7] : memref<8xf32, #tpu.memory_space<smem>>
      memref.store %cst_72, %arg10[%c7] : memref<8xf32, #tpu.memory_space<smem>>
    } else {
    }
    return
  }
  func.func @transform_0(%arg0: i32) -> (i32, i32) {
    %c0_i32 = arith.constant 0 : i32
    %c0_i32_0 = arith.constant 0 : i32
    return %arg0, %c0_i32 : i32, i32
  }
  func.func @transform_1(%arg0: i32) -> (i32, i32) {
    %c0_i32 = arith.constant 0 : i32
    %c0_i32_0 = arith.constant 0 : i32
    return %arg0, %c0_i32 : i32, i32
  }
  func.func @transform_2(%arg0: i32) -> (i32, i32) {
    %c0_i32 = arith.constant 0 : i32
    %c0_i32_0 = arith.constant 0 : i32
    return %arg0, %c0_i32 : i32, i32
  }
  func.func @transform_3(%arg0: i32) -> (i32, i32) {
    %c0_i32 = arith.constant 0 : i32
    %c0_i32_0 = arith.constant 0 : i32
    return %arg0, %c0_i32 : i32, i32
  }
  func.func @transform_4(%arg0: i32) -> (i32, i32) {
    %c0_i32 = arith.constant 0 : i32
    %c0_i32_0 = arith.constant 0 : i32
    return %arg0, %c0_i32 : i32, i32
  }
  func.func @transform_5(%arg0: i32) -> (i32, i32) {
    %c0_i32 = arith.constant 0 : i32
    %c0_i32_0 = arith.constant 0 : i32
    return %arg0, %c0_i32 : i32, i32
  }
  func.func @transform_6(%arg0: i32) -> (i32, i32) {
    %c0_i32 = arith.constant 0 : i32
    %c0_i32_0 = arith.constant 0 : i32
    return %arg0, %c0_i32 : i32, i32
  }
  func.func @transform_7(%arg0: i32) -> (i32, i32) {
    %c0_i32 = arith.constant 0 : i32
    %c0_i32_0 = arith.constant 0 : i32
    return %arg0, %c0_i32 : i32, i32
  }
  func.func @transform_8(%arg0: i32) -> (i32, i32) {
    %c0_i32 = arith.constant 0 : i32
    %c0_i32_0 = arith.constant 0 : i32
    return %arg0, %c0_i32 : i32, i32
  }
  func.func @transform_9(%arg0: i32) -> i32 {
    %c0_i32 = arith.constant 0 : i32
    %c0_i32_0 = arith.constant 0 : i32
    return %c0_i32 : i32
  }
}

</mosaic_0001>

<bundles_post_ra>
// kernel: tpu_custom_call.1
= control target key start
LH: loop header
LB: loop body
LE: loop exit
PB: predicated region body
PF: predicated region fallthrough
CT: control target
= control target key end

     0   :  { %14 = vsyncpa [#allocation8], 0  ;;  %s555_s0 = inlined_call_operand.hbm [shape: f32[8,128], index: 0, kind: input, shape index: {}]   ;;  %s556_s1 = inlined_call_operand.vmem [shape: f32[1,128], index: 1, kind: input, shape index: {}]   ;;  %s557_s2 = inlined_call_operand.hbm [shape: f32[8,128], index: 2, kind: input, shape index: {}]   ;;  %s558_s3 = inlined_call_operand.hbm [shape: f32[12,128], index: 3, kind: input, shape index: {}]   ;;  %s559_s4 = inlined_call_operand.hbm [shape: f32[12,128], index: 4, kind: input, shape index: {}]   ;;  %s560_s5 = inlined_call_operand.vmem [shape: f32[8,128], index: 5, kind: input, shape index: {}]   ;;  %s561_s6 = inlined_call_operand.vmem [shape: f32[8,128], index: 6, kind: input, shape index: {}]   ;;  %s562_s7 = inlined_call_operand.vmem [shape: f32[8,128], index: 7, kind: input, shape index: {}]   ;;  %s563_s8 = inlined_call_operand.hbm [shape: f32[8,128], index: 8, kind: input, shape index: {}]   ;;  %s564_s9 = inlined_call_operand.hbm [shape: f32[8], index: 9, kind: output, shape index: {}]  }
   0x1   :  { %15 = vsyncpa [#allocation11], 0 }
   0x2   :  { %16 = vsyncpa [#allocation14], 0 }
   0x3   :  { %17 = vsyncpa [#allocation9], 0  ;;  %s405_s30 = smov [#allocation10]   ;;  %s277_s13 = scalar_lea.hbm %s557_s2, 128 }
   0x4   :  { %s36_s10 = sshll.u32 %s405_s30, 4  ;;  %p278_p0 = scmp.ne.s32.totalorder %s557_s2, %s277_s13  ;;  %s37_s10 = int_to_ptr.vmem [resolvable:$true] %s36_s10 }
   0x5   :  { %p281_p1 = scmp.lt.u32.totalorder %s277_s13, %s557_s2 }
   0x7   :  { %p283_p2 = pnand %p281_p1, %p278_p0 }
   0x9   :  { %286 = shalt.err (!%p283_p2)
}
   0xa   :  { %s287_s18 = scalar_lea.vmem %s37_s10, 128  ;;  %p292_p4 = scmp.lt.s32.totalorder %s37_s10, %s37_s10 }
   0xb   :  { %p288_p3 = scmp.ne.s32.totalorder %s37_s10, %s287_s18  ;;  %p293_p5 = scmp.lt.s32.totalorder %s287_s18, %s287_s18 }
   0xd   :  { %p294_p6 = por %p293_p5, %p292_p4 }
   0xf   :  { %p295_p7 = pnand %p294_p6, %p288_p3 }
  0x11   :  { %298 = shalt.err (!%p295_p7)
}
  0x12   :  { %39 = dma.hbm_to_vmem [thread:$0]  %s557_s2, 128, %s37_s10, [#allocation11]  }
  0x13   :  { %s406_s21 = smov [#allocation13]   ;;  %s407_s23 = smov [#allocation7]  }
  0x14   :  { %s57_s22 = sshll.u32 %s406_s21, 4  ;;  %s24_s24 = sshll.u32 %s407_s23, 4  ;;  %s58_s22 = int_to_ptr.vmem [resolvable:$true] %s57_s22  ;;  %s25_s24 = int_to_ptr.vmem [resolvable:$true] %s24_s24 }
  0x15   :  { %s299_s27 = scalar_lea.hbm %s559_s4, 256 }
  0x16   :  { %p300_p8 = scmp.ne.s32.totalorder %s559_s4, %s299_s27  ;;  %p303_p9 = scmp.lt.u32.totalorder %s299_s27, %s559_s4 }
  0x18   :  { %p305_p10 = pnand %p303_p9, %p300_p8 }
  0x1a   :  { %308 = shalt.err (!%p305_p10)
}
  0x1b   :  { %s309_s2 = scalar_lea.vmem %s58_s22, 256  ;;  %p314_p12 = scmp.lt.s32.totalorder %s58_s22, %s58_s22 }
  0x1c   :  { %p310_p11 = scmp.ne.s32.totalorder %s58_s22, %s309_s2  ;;  %p315_p13 = scmp.lt.s32.totalorder %s309_s2, %s309_s2 }
  0x1e   :  { %p316_p0 = por %p315_p13, %p314_p12 }
  0x20   :  { %p317_p1 = pnand %p316_p0, %p310_p11 }
  0x22   :  { %320 = shalt.err (!%p317_p1)
}
  0x23   :  { %s408_s10 = smov 128   ;;  %s409_s12 = smov 8  }
  0x24   :  { %63 = dma.hbm_to_vmem [thread:$0]  %s559_s4, 256, %s58_s22, [#allocation14], %s408_s10, %s408_s10, %s409_s12  }
  0x25   :  { %s321_s17 = scalar_lea.hbm %s555_s0, 128 }
  0x26   :  { %p322_p2 = scmp.ne.s32.totalorder %s555_s0, %s321_s17  ;;  %p325_p3 = scmp.lt.u32.totalorder %s321_s17, %s555_s0 }
  0x28   :  { %p327_p4 = pnand %p325_p3, %p322_p2 }
  0x2a   :  { %330 = shalt.err (!%p327_p4)
}
  0x2b   :  { %s331_s23 = scalar_lea.vmem %s25_s24, 128  ;;  %p336_p6 = scmp.lt.s32.totalorder %s25_s24, %s25_s24 }
  0x2c   :  { %p332_p5 = scmp.ne.s32.totalorder %s25_s24, %s331_s23  ;;  %p337_p7 = scmp.lt.s32.totalorder %s331_s23, %s331_s23 }
  0x2e   :  { %p338_p8 = por %p337_p7, %p336_p6 }
  0x30   :  { %p339_p9 = pnand %p338_p8, %p332_p5 }
  0x32   :  { %342 = shalt.err (!%p339_p9)
}
  0x33   :  { %27 = dma.hbm_to_vmem [thread:$0]  %s555_s0, 128, %s25_s24, [#allocation8]  }
  0x34   :  { %s410_s25 = smov [#allocation12]   ;;  %s411_s27 = smov [#allocation15]  }
  0x35   :  { %s45_s26 = sshll.u32 %s410_s25, 4  ;;  %s76_s28 = sshll.u32 %s411_s27, 4  ;;  %s46_s26 = int_to_ptr.vmem [resolvable:$true] %s45_s26  ;;  %s77_s28 = int_to_ptr.vmem [resolvable:$true] %s76_s28 }
  0x36   :  { %s343_s11 = scalar_lea.hbm %s558_s3, 256 }
  0x37   :  { %p344_p10 = scmp.ne.s32.totalorder %s558_s3, %s343_s11  ;;  %p347_p11 = scmp.lt.u32.totalorder %s343_s11, %s558_s3 }
  0x39   :  { %p349_p12 = pnand %p347_p11, %p344_p10 }
  0x3b   :  { %352 = shalt.err (!%p349_p12)
}
  0x3c   :  { %s353_s0 = scalar_lea.vmem %s46_s26, 256  ;;  %p358_p0 = scmp.lt.s32.totalorder %s46_s26, %s46_s26 }
  0x3d   :  { %p354_p13 = scmp.ne.s32.totalorder %s46_s26, %s353_s0  ;;  %p359_p1 = scmp.lt.s32.totalorder %s353_s0, %s353_s0 }
  0x3f   :  { %p360_p2 = por %p359_p1, %p358_p0 }
  0x41   :  { %p361_p3 = pnand %p360_p2, %p354_p13 }
  0x43   :  { %364 = shalt.err (!%p361_p3)
}
  0x44   :  { %51 = dma.hbm_to_vmem [thread:$0]  %s558_s3, 256, %s46_s26, [#allocation11], %s408_s10, %s408_s10, %s409_s12  }
  0x45   :  { %s365_s19 = scalar_lea.hbm %s563_s8, 128 }
  0x46   :  { %p366_p4 = scmp.ne.s32.totalorder %s563_s8, %s365_s19  ;;  %p369_p5 = scmp.lt.u32.totalorder %s365_s19, %s563_s8 }
  0x48   :  { %p371_p6 = pnand %p369_p5, %p366_p4 }
  0x4a   :  { %374 = shalt.err (!%p371_p6)
}
  0x4b   :  { %s375_s22 = scalar_lea.vmem %s77_s28, 128  ;;  %p380_p8 = scmp.lt.s32.totalorder %s77_s28, %s77_s28 }
  0x4c   :  { %p376_p7 = scmp.ne.s32.totalorder %s77_s28, %s375_s22  ;;  %p381_p9 = scmp.lt.s32.totalorder %s375_s22, %s375_s22 }
  0x4e   :  { %p382_p10 = por %p381_p9, %p380_p8 }
  0x50   :  { %p383_p11 = pnand %p382_p10, %p376_p7 }
  0x52   :  { %386 = shalt.err (!%p383_p11)
}
  0x53   :  { %79 = dma.hbm_to_vmem [thread:$0]  %s563_s8, 128, %s77_s28, [#allocation14]  }
  0x54   :  { %397 = dma.done.wait [#allocation8], 128  }
  0x55   :  { %398 = vsyncadd [#allocation8], 4294967168 }
  0x56   :  { %399 = dma.done.wait [#allocation11], 384  }
  0x57   :  { %400 = vsyncadd [#allocation11], 4294966912 }
  0x58   :  { %401 = dma.done.wait [#allocation14], 384  }
  0x59   :  { %402 = vsyncadd [#allocation14], 4294966912  ;;  %v412_v0 = vmov 0.0   ;;  %v104_v1 = vld [vmem:[#allocation7] sm:$0xff]  ;;  %v118_v2 = vld [vmem:[#allocation10] sm:$0xff]  ;;  %vm134_vm0 = vcmask 1043456  }
  0x5a   :  { %100 = vst [vmem:[#allocation3] sm:$0xff] %v412_v0  ;;  %103 = vst [vmem:[#allocation6] sm:$0xff] %v412_v0  ;;  %271 = vlog2.f32 %v104_v1  ;;  %v145_v3 = vld [vmem:[%s560_s5] sm:$0xff]  ;;  %v126_v6 = vld [vmem:[#allocation12 + $0x8] sm:$0xf]  ;;  %s387_s18 = scalar_lea.hbm %s564_s9, 16 }
  0x5b   :  { %273 = vlog2.f32 %v118_v2  ;;  %v111_v4 = vld [vmem:[%s556_s1] sm:$0x1]  ;;  %v127_v7 = vld [vmem:[#allocation13] sm:$0xff]  ;;  %v128_v8 = vld [vmem:[#allocation13 + $0x8] sm:$0xf]  ;;  %s413_s1 = smov 0.0   ;;  %p388_p12 = scmp.ne.s32.totalorder %s564_s9, %s387_s18 }
  0x5c   :  { %v125_v5 = vld [vmem:[#allocation12] sm:$0xff]  ;;  %275 = vlog2.f32 %v111_v4  ;;  %v130_v13 = vsub.f32 %v126_v6, %v128_v8  ;;  %230 = sst [smem:[#allocation16 + $0x5]] %s413_s1  ;;  %p391_p13 = scmp.lt.u32.totalorder %s387_s18, %s564_s9 }
  0x5d   :  { %v146_v9 = vld [vmem:[%s561_s6] sm:$0xff]  ;;  %v129_v12 = vsub.f32 %v125_v5, %v127_v7  ;;  %232 = sst [smem:[#allocation16 + $0x6]] %s413_s1 }
  0x5e   :  { %v153_v10 = vld [vmem:[%s562_s7] sm:$0xff]  ;;  %v132_v15 = vmul.f32 %v130_v13, %v130_v13  ;;  %v147_v16 = vsub.f32 %v145_v3, %v146_v9  ;;  %234 = sst [smem:[#allocation16 + $0x7]] %s413_s1  ;;  %p393_p0 = pnand %p391_p13, %p388_p12 }
  0x5f   :  { %v154_v11 = vld [vmem:[#allocation15] sm:$0xff]  ;;  %v131_v14 = vmul.f32 %v129_v12, %v129_v12 }
  0x60   :  { %v155_v17 = vsub.f32 %v153_v10, %v154_v11  ;;  %v135_v18 = vsel %vm134_vm0, %v132_v15, 0.0  ;;  %v148_v21 = vand.u32 2147483647, %v147_v16 }
  0x61   :  { %v136_v19 = vadd.f32 %v135_v18, %v131_v14  ;;  %v114_v28 = vld [vmem:[#allocation3] sm:$0x1]  ;;  %v133_v36 = vld [vmem:[#allocation6] sm:$0x1] }
  0x62   :  { %v156_v22 = vand.u32 2147483647, %v155_v17 }
  0x63   :  { %v137_v23 = vrot.slane %v136_v19, 4 }
  0x64   :  { %v272_v20 = vpop.eup %271  ;;  %v159_v31 = vadd.f32 %v156_v22, %v148_v21 }
  0x65   :  { %v274_v24 = vpop.eup %273  ;;  %v106_v25 = vmul.f32 0.6931472, %v272_v20  ;;  %v138_v29 = vadd.f32 %v137_v23, %v136_v19 }
  0x66   :  { %v276_v26 = vpop.eup %275  ;;  %v120_v27 = vmul.f32 0.6931472, %v274_v24 }
  0x67   :  { %165 = vadd.xlane.f32.xlu0 %v106_v25  ;;  %v113_v30 = vmul.f32 0.6931472, %v276_v26  ;;  %v139_v32 = vrot.slane %v138_v29, 2 }
  0x68   :  { %191 = vadd.xlane.f32.xlu1 %v120_v27 }
  0x69   :  { %v116_v33 = vadd.f32 %v114_v28, %v113_v30  ;;  %v140_v34 = vadd.f32 %v139_v32, %v138_v29 }
  0x6b   :  { %117 = vst [vmem:[#allocation3] sm:$0x1] %v116_v33  ;;  %v141_v35 = vrot.slane %v140_v34, 1 }
  0x6c   :  { %204 = vadd.xlane.f32.xlu1 %v159_v31 }
  0x6d   :  { %v142_v37 = vadd.f32 %v141_v35, %v140_v34 }
  0x6f   :  { %v143_v38 = vadd.f32 %v142_v37, %v133_v36 }
  0x71   :  { %144 = vst [vmem:[#allocation6] sm:$0x1] %v143_v38 }
  0x72   :  { %v177_v39 = vld [vmem:[#allocation3] sm:$0xff] }
  0x73   :  { %178 = vadd.xlane.f32.xlu0 %v177_v39 }
  0x78   :  { %v216_v40 = vld [vmem:[#allocation6] sm:$0xff] }
  0x79   :  { %217 = vadd.xlane.f32.xlu0 %v216_v40 }
  0xf4   :  { %v166_v41 = vpop.xlane.xlu0 %165 }
  0xf5   :  { %v167_v42 = vrot.slane %v166_v41, 4  ;;  %v192_v43 = vpop.xlane.xlu1 %191 }
  0xf6   :  { %v193_v45 = vrot.slane %v192_v43, 4 }
  0xf7   :  { %v168_v44 = vadd.f32 %v167_v42, %v166_v41 }
  0xf8   :  { %v194_v50 = vadd.f32 %v193_v45, %v192_v43 }
  0xf9   :  { %v169_v46 = vrot.slane %v168_v44, 2  ;;  %v205_v47 = vpop.xlane.xlu1 %204 }
  0xfa   :  { %v206_v48 = vrot.slane %v205_v47, 4  ;;  %v195_v55 = vrot.slane %v194_v50, 2 }
  0xfb   :  { %v170_v49 = vadd.f32 %v169_v46, %v168_v44 }
  0xfc   :  { %v207_v51 = vadd.f32 %v206_v48, %v205_v47  ;;  %v196_v60 = vadd.f32 %v195_v55, %v194_v50 }
  0xfd   :  { %v171_v52 = vrot.slane %v170_v49, 1 }
  0xfe   :  { %v208_v53 = vrot.slane %v207_v51, 2  ;;  %v197_v2 = vrot.slane %v196_v60, 1 }
  0xff   :  { %v172_v54 = vadd.f32 %v171_v52, %v170_v49 }
 0x100   :  { %v179_v56 = vpop.xlane.xlu0 %178  ;;  %v209_v58 = vadd.f32 %v208_v53, %v207_v51  ;;  %v198_v8 = vadd.f32 %v197_v2, %v196_v60 }
 0x101   :  { %v180_v57 = vrot.slane %v179_v56, 4  ;;  %251 = vpush %v172_v54 }
 0x102   :  { %v210_v0 = vrot.slane %v209_v58, 1 }
 0x103   :  { %v181_v59 = vadd.f32 %v180_v57, %v179_v56 }
 0x104   :  { %v211_v6 = vadd.f32 %v210_v0, %v209_v58 }
 0x105   :  { %v182_v61 = vrot.slane %v181_v59, 2 }
 0x106   :  { %v218_v62 = vpop.xlane.xlu0 %217 }
 0x107   :  { %v183_v63 = vadd.f32 %v182_v61, %v181_v59  ;;  %v219_v1 = vrot.slane %v218_v62, 4 }
 0x109   :  { %v184_v3 = vrot.slane %v183_v63, 1  ;;  %v220_v4 = vadd.f32 %v219_v1, %v218_v62 }
 0x10b   :  { %v185_v5 = vadd.f32 %v184_v3, %v183_v63  ;;  %v221_v7 = vrot.slane %v220_v4, 2 }
 0x10d   :  { %253 = vpush %v185_v5  ;;  %v222_v9 = vadd.f32 %v221_v7, %v220_v4 }
 0x10e   :  { %255 = vpush %v198_v8 }
 0x10f   :  { %257 = vpush %v211_v6  ;;  %v223_v10 = vrot.slane %v222_v9, 1 }
 0x111   :  { %v224_v11 = vadd.f32 %v223_v10, %v222_v9 }
 0x113   :  { %259 = vpush %v224_v11 }
 0x132   :  { %s252_s5 = spop %251 }
 0x133   :  { %s174_s6 = smul.f32 -0.0028177637, %s252_s5 }
 0x135   :  { %176 = sst [smem:[#allocation16]] %s174_s6 }
 0x13e   :  { %s254_s7 = spop %253 }
 0x13f   :  { %s187_s11 = smul.f32 -0.0028177637, %s254_s7  ;;  %s256_s2 = spop %255 }
 0x140   :  { %s200_s13 = smul.f32 -0.0028177637, %s256_s2  ;;  %s258_s14 = spop %257 }
 0x141   :  { %189 = sst [smem:[#allocation16 + $0x1]] %s187_s11  ;;  %s213_s15 = smul.f32 0.001953125, %s258_s14 }
 0x142   :  { %202 = sst [smem:[#allocation16 + $0x2]] %s200_s13 }
 0x143   :  { %215 = sst [smem:[#allocation16 + $0x3]] %s213_s15 }
 0x144   :  { %s260_s0 = spop %259 }
 0x145   :  { %s226_s24 = smul.f32 42.333984, %s260_s0 }
 0x147   :  { %228 = sst [smem:[#allocation16 + $0x4]] %s226_s24 }
 0x148   :  { %396 = shalt.err (!%p393_p0)
}
 0x149   :  { %s414_s4 = smov [#allocation16]  }
 0x14a   :  { %242 = dma.smem_to_hbm %s414_s4, 16, %s564_s9, [#allocation9]  }
 0x14b   :  { %403 = dma.done.wait [#allocation9], 16  }
 0x14c   :  { %404 = vsyncadd [#allocation9], 4294967280 }
 0x14d   :  { %246 = sfence }
 0x14e   :  { %247 = vsyncpa [#allocation8], 1 }
 0x14f   :  { %248 = vsyncpa [#allocation11], 1 }
 0x150   :  { %249 = vsyncpa [#allocation14], 1 }
 0x151   :  { %250 = vsyncpa [#allocation9], 1 }

</bundles_post_ra>
